<compile_context>
chip_gen: v7x
topology: tpu7x:2x2x1
jax: 0.10.0
libtpu: 0.0.40
codegen_flags: <defaults>
</compile_context>

<pallas_src>
import jax
import jax.numpy as jnp
from jax.experimental import pallas as pl
from jax.experimental.pallas import tpu as pltpu

INPUT_SIZE = 24
HIDDEN = 64
GATES = 4 * HIDDEN       # 256 fused gate lanes, kernel gate order: i, f, o, g
OUT_DIM = 8
OUT_PAD = 128            # lane-dense head output (sliced back to 8 in the wrapper)
SUBLANE = 8
UNROLL_T = 16            # full Python unroll up to this many timesteps


def lstm_head_kernel(x_ref, wih_ref, whh_ref, b_ref,
                     w1_ref, b1_ref, w2_ref, b2_ref,
                     out_ref, xproj_scr):
    Bp = out_ref.shape[0]                 # padded batch (multiple of 8 sublanes)
    T = x_ref.shape[0] // Bp              # static trip count

    # ---- Phase 1: input projection for ALL timesteps, one fused bf16 matmul --------------
    # (T*Bp, 24)bf16 @ (24, 256)bf16 -> f32, + (1, 256)f32.  Combined bias (b_ih + b_hh) is
    # folded in here so the serial recurrence below has no bias adds at all.
    xproj_scr[...] = (
        jnp.dot(x_ref[...], wih_ref[...], preferred_element_type=jnp.float32)
        + b_ref[...])

    # Hoisted fused recurrent weights: (64, 256) bf16 = 8 vregs of live range.  Fine at the
    # small T used here; drop the hoist (read whh_ref[...] per step) if a bundle dump shows
    # vreg spills at larger T.
    whh = whh_ref[...]

    def gate_step(gates, h, c):
        # Kernel gate order is (i, f, o, g): sigmoid over one contiguous 192-lane slab,
        # tanh over the 64-lane tail -> 2 EUP dispatches per step instead of 4.
        sig = jax.nn.sigmoid(gates[:, :3 * HIDDEN])
        g_g = jnp.tanh(gates[:, 3 * HIDDEN:])
        i_g = sig[:, 0 * HIDDEN:1 * HIDDEN]
        f_g = sig[:, 1 * HIDDEN:2 * HIDDEN]
        o_g = sig[:, 2 * HIDDEN:3 * HIDDEN]
        c_new = f_g * c + i_g * g_g                          # f32 state math
        h_new = o_g * jnp.tanh(c_new)
        return h_new, c_new

    h = jnp.zeros((Bp, HIDDEN), jnp.float32)
    c = jnp.zeros((Bp, HIDDEN), jnp.float32)

    # ---- Phase 2: serial recurrence ------------------------------------------------------
    # Per step: one bf16 (Bp,64)x(64,256) matmul (f32 accumulate) + elementwise gate math.
    if T <= UNROLL_T:
        for t in range(T):
            gates = xproj_scr[t * Bp:(t + 1) * Bp, :] + jnp.dot(
                h.astype(jnp.bfloat16), whh, preferred_element_type=jnp.float32)
            h, c = gate_step(gates, h, c)
    else:
        # Moderate unroll keeps LLO scheduling visibility without the vreg blowup of a
        # full static unroll at large T.
        def body(t, carry):
            h_c, c_c = carry
            off = pl.multiple_of(t * Bp, SUBLANE)
            gates = xproj_scr[pl.ds(off, Bp), :] + jnp.dot(
                h_c.astype(jnp.bfloat16), whh, preferred_element_type=jnp.float32)
            return gate_step(gates, h_c, c_c)
        h, c = jax.lax.fori_loop(0, T, body, (h, c), unroll=4)

    # ---- Phase 3: MLP head on h_T (run once, off the serial path; kept f32) --------------
    z = jnp.dot(h, w1_ref[...], preferred_element_type=jnp.float32) + b1_ref[...]
    z = jnp.maximum(z, 0.0)
    z = jnp.dot(z, w2_ref[...], preferred_element_type=jnp.float32) + b2_ref[...]
    # Padded batch rows / output lanes hold sigmoid(garbage); sliced off in the wrapper.
    out_ref[...] = jax.nn.sigmoid(z).astype(out_ref.dtype)


@jax.jit
def rnn_forward(x, params):
    """x: (B, T, 24) float32, batch-first (matches PyTorch). params: pack_params output.
    Returns (B, 8) float32."""
    wih, whh, b, w1, b1, w2p, b2p = params
    B, T, I = x.shape
    assert I == INPUT_SIZE
    Bp = ((B + SUBLANE - 1) // SUBLANE) * SUBLANE      # pad batch to full sublanes

    # Layout plumbing only (fused by jit): time-major, batch-pad, flatten, bf16 cast.
    x_tm = jnp.transpose(x, (1, 0, 2))                 # (T, B, 24)
    x_tm = jnp.pad(x_tm, ((0, 0), (0, Bp - B), (0, 0)))
    x2d = x_tm.reshape(T * Bp, I).astype(jnp.bfloat16)  # (T*Bp, 24)

    # Total resident data < 200 KiB -> everything lives in VMEM; no grid, no tiling needed.
    out_pad = pl.pallas_call(
        lstm_head_kernel,
        out_shape=jax.ShapeDtypeStruct((Bp, OUT_PAD), jnp.float32),
        in_specs=[pl.BlockSpec(memory_space=pltpu.MemorySpace.VMEM) for _ in range(8)],
        out_specs=pl.BlockSpec(memory_space=pltpu.MemorySpace.VMEM),
        scratch_shapes=[pltpu.VMEM((T * Bp, GATES), jnp.float32)],   # X_proj
        # TODO(synk): for long sequences, chunk X_proj / set vmem_limit_bytes (v7x has 64 MiB
        # physical VMEM); irrelevant at T=8 (scratch is 64 KiB).
    )(x2d, wih, whh, b, w1, b1, w2p, b2p)
    return out_pad[:B, :OUT_DIM]


def init_params(key):
    """Deterministic synthetic params in PyTorch layout:
    LSTM(24,64): w_ih (256,24), w_hh (256,64), b_ih (256,), b_hh (256,)  [gate order i,f,g,o]
    Linear(64,64): w1 (64,64), b1 (64,)   Linear(64,8): w2 (8,64), b2 (8,)."""
    ks = jax.random.split(key, 8)
    bound = 1.0 / (HIDDEN ** 0.5)

    def u(k, shape):
        return jax.random.uniform(k, shape, jnp.float32, -bound, bound)

    w_ih = u(ks[0], (GATES, INPUT_SIZE))
    w_hh = u(ks[1], (GATES, HIDDEN))
    b_ih = u(ks[2], (GATES,))
    b_hh = u(ks[3], (GATES,))
    w1 = u(ks[4], (HIDDEN, HIDDEN))
    b1 = u(ks[5], (HIDDEN,))
    w2 = u(ks[6], (OUT_DIM, HIDDEN))
    b2 = u(ks[7], (OUT_DIM,))
    return (w_ih, w_hh, b_ih, b_hh, w1, b1, w2, b2)


def pack_params(torch_params):
    """One-time packing from PyTorch layout to the kernel layout:
      * gate rows reordered (i,f,g,o) -> (i,f,o,g) so activations are vreg-aligned slabs,
      * weights pre-transposed to (in, out),
      * b = b_ih + b_hh fused,
      * W_ih / W_hh cast to bf16 (MXU-native; f32 accumulate in-kernel),
      * head w2/b2 lane-padded 8 -> 128 for an unmasked dense store."""
    w_ih, w_hh, b_ih, b_hh, w1, b1, w2, b2 = torch_params

    def reorder(a):  # along the 4H axis: (i, f, g, o) -> (i, f, o, g)
        i, f, g, o = jnp.split(a, 4, axis=0)
        return jnp.concatenate([i, f, o, g], axis=0)

    wih_k = reorder(w_ih).T.astype(jnp.bfloat16)                           # (24, 256)
    whh_k = reorder(w_hh).T.astype(jnp.bfloat16)                           # (64, 256)
    b_k = reorder(b_ih + b_hh).reshape(1, GATES).astype(jnp.float32)       # (1, 256)
    w1_k = w1.T.astype(jnp.float32)                                        # (64, 64)
    b1_k = b1.reshape(1, HIDDEN).astype(jnp.float32)                       # (1, 64)
    w2_k = jnp.pad(w2.T, ((0, 0), (0, OUT_PAD - OUT_DIM))).astype(jnp.float32)   # (64, 128)
    b2_k = jnp.pad(b2.reshape(1, OUT_DIM),
                   ((0, 0), (0, OUT_PAD - OUT_DIM))).astype(jnp.float32)   # (1, 128)
    return (wih_k, whh_k, b_k, w1_k, b1_k, w2_k, b2_k)


def reference_forward(x, torch_params):
    """Pure-JAX f32 reference of the same math from PyTorch-layout params (also validates
    the kernel's gate reorder / fuse / transpose packing)."""
    w_ih, w_hh, b_ih, b_hh, w1, b1, w2, b2 = torch_params
    B, T, _ = x.shape
    h = jnp.zeros((B, HIDDEN), jnp.float32)
    c = jnp.zeros((B, HIDDEN), jnp.float32)
    for t in range(T):
        g = x[:, t, :] @ w_ih.T + h @ w_hh.T + b_ih + b_hh
        i = jax.nn.sigmoid(g[:, 0 * HIDDEN:1 * HIDDEN])
        f = jax.nn.sigmoid(g[:, 1 * HIDDEN:2 * HIDDEN])
        gg = jnp.tanh(g[:, 2 * HIDDEN:3 * HIDDEN])
        o = jax.nn.sigmoid(g[:, 3 * HIDDEN:4 * HIDDEN])
        c = f * c + i * gg
        h = o * jnp.tanh(c)
    z = jnp.maximum(h @ w1.T + b1, 0.0)
    return jax.nn.sigmoid(z @ w2.T + b2)


if __name__ == "__main__":
    key = jax.random.PRNGKey(0)
    k_x, k_p = jax.random.split(key)

    B, T = 2, 8
    x = jax.random.normal(k_x, (B, T, INPUT_SIZE), jnp.float32)
    torch_params = init_params(k_p)
    params = pack_params(torch_params)

    out = rnn_forward(x, params)
    out = jax.block_until_ready(out)

    ref = reference_forward(x, torch_params)
    assert out.shape == (B, OUT_DIM)
    # bf16 MXU operands on the recurrent/input-projection matmuls (f32 accumulate, f32 state
    # math): expected deviation vs the pure-f32 reference is ~1e-3; 1e-2 still catches any
    # structural bug (gate order, packing, fusion).
    # TODO(synk): also validate against the PyTorch CPU reference offline for full parity.
    assert jnp.allclose(out, ref, rtol=1e-2, atol=1e-2), "mismatch vs JAX reference"

    print("KERNEL_OK")
</pallas_src>

<mosaic_0001>
module attributes {stable_mosaic.version = 11 : i64} {
  func.func @lstm_head_kernel(%arg0: memref<64x24xbf16, #tpu.memory_space<vmem>>, %arg1: memref<24x256xbf16, #tpu.memory_space<vmem>>, %arg2: memref<64x256xbf16, #tpu.memory_space<vmem>>, %arg3: memref<1x256xf32, #tpu.memory_space<vmem>>, %arg4: memref<64x64xf32, #tpu.memory_space<vmem>>, %arg5: memref<1x64xf32, #tpu.memory_space<vmem>>, %arg6: memref<64x128xf32, #tpu.memory_space<vmem>>, %arg7: memref<1x128xf32, #tpu.memory_space<vmem>>, %arg8: memref<8x128xf32, #tpu.memory_space<vmem>>, %arg9: memref<64x256xf32, #tpu.memory_space<vmem>>) attributes {dimension_semantics = [], scalar_prefetch = 0 : i64, scratch_operands = 1 : i64, tpu.core_type = #tpu.core_type<tc>} {
    %c0 = arith.constant 0 : index
    %c0_0 = arith.constant 0 : index
    %0 = vector.load %arg0[%c0, %c0_0] : memref<64x24xbf16, #tpu.memory_space<vmem>>, vector<64x24xbf16>
    %c0_1 = arith.constant 0 : index
    %c0_2 = arith.constant 0 : index
    %1 = vector.load %arg1[%c0_1, %c0_2] : memref<24x256xbf16, #tpu.memory_space<vmem>>, vector<24x256xbf16>
    %cst = arith.constant dense<0.000000e+00> : vector<64x256xf32>
    %2 = tpu.matmul %0, %1, %cst {dimension_numbers = #tpu.dot_dimension_numbers<[1], [0], [0], [1], [0, 0, 1, 1], [], []>} : vector<64x24xbf16>, vector<24x256xbf16>, vector<64x256xf32> -> vector<64x256xf32>
    %c0_3 = arith.constant 0 : index
    %c0_4 = arith.constant 0 : index
    %3 = vector.load %arg3[%c0_3, %c0_4] : memref<1x256xf32, #tpu.memory_space<vmem>>, vector<1x256xf32>
    %4 = vector.broadcast %3 : vector<1x256xf32> to vector<64x256xf32>
    %5 = arith.addf %2, %4 : vector<64x256xf32>
    %c0_5 = arith.constant 0 : index
    %c0_6 = arith.constant 0 : index
    %6 = vector.load %arg9[%c0_5, %c0_6] : memref<64x256xf32, #tpu.memory_space<vmem>>, vector<64x256xf32>
    tpu.vector_store %arg9[%c0_5, %c0_6], %5 {strides = array<i32>} : memref<64x256xf32, #tpu.memory_space<vmem>>, vector<64x256xf32>,
    %c0_7 = arith.constant 0 : index
    %c0_8 = arith.constant 0 : index
    %7 = vector.load %arg2[%c0_7, %c0_8] : memref<64x256xbf16, #tpu.memory_space<vmem>>, vector<64x256xbf16>
    %cst_9 = arith.constant 0.000000e+00 : f32
    %8 = vector.broadcast %cst_9 : f32 to vector<8x64xf32>
    %cst_10 = arith.constant 0.000000e+00 : f32
    %9 = vector.broadcast %cst_10 : f32 to vector<8x64xf32>
    %c0_11 = arith.constant 0 : index
    %c0_12 = arith.constant 0 : index
    %10 = vector.load %arg9[%c0_11, %c0_12] : memref<64x256xf32, #tpu.memory_space<vmem>>, vector<8x256xf32>
    %11 = arith.truncf %8 : vector<8x64xf32> to vector<8x64xbf16>
    %cst_13 = arith.constant dense<0.000000e+00> : vector<8x256xf32>
    %12 = tpu.matmul %11, %7, %cst_13 {dimension_numbers = #tpu.dot_dimension_numbers<[1], [0], [0], [1], [0, 0, 1, 1], [], []>} : vector<8x64xbf16>, vector<64x256xbf16>, vector<8x256xf32> -> vector<8x256xf32>
    %13 = arith.addf %10, %12 : vector<8x256xf32>
    %14 = vector.extract_strided_slice %13 {offsets = [0, 0], sizes = [8, 192], strides = [1, 1]} : vector<8x256xf32> to vector<8x192xf32>
    %15 = arith.negf %14 : vector<8x192xf32>
    %16 = math.exp %15 : vector<8x192xf32>
    %cst_14 = arith.constant 1.000000e+00 : f32
    %17 = vector.broadcast %cst_14 : f32 to vector<8x192xf32>
    %18 = arith.addf %17, %16 : vector<8x192xf32>
    %19 = arith.divf %17, %18 : vector<8x192xf32>
    %20 = vector.extract_strided_slice %13 {offsets = [0, 192], sizes = [8, 64], strides = [1, 1]} : vector<8x256xf32> to vector<8x64xf32>
    %21 = math.tanh %20 : vector<8x64xf32>
    %22 = vector.extract_strided_slice %19 {offsets = [0, 0], sizes = [8, 64], strides = [1, 1]} : vector<8x192xf32> to vector<8x64xf32>
    %23 = vector.extract_strided_slice %19 {offsets = [0, 64], sizes = [8, 64], strides = [1, 1]} : vector<8x192xf32> to vector<8x64xf32>
    %24 = vector.extract_strided_slice %19 {offsets = [0, 128], sizes = [8, 64], strides = [1, 1]} : vector<8x192xf32> to vector<8x64xf32>
    %25 = arith.mulf %23, %9 : vector<8x64xf32>
    %26 = arith.mulf %22, %21 : vector<8x64xf32>
    %27 = arith.addf %25, %26 : vector<8x64xf32>
    %28 = math.tanh %27 : vector<8x64xf32>
    %29 = arith.mulf %24, %28 : vector<8x64xf32>
    %c8 = arith.constant 8 : index
    %c0_15 = arith.constant 0 : index
    %30 = vector.load %arg9[%c8, %c0_15] : memref<64x256xf32, #tpu.memory_space<vmem>>, vector<8x256xf32>
    %31 = arith.truncf %29 : vector<8x64xf32> to vector<8x64xbf16>
    %cst_16 = arith.constant dense<0.000000e+00> : vector<8x256xf32>
    %32 = tpu.matmul %31, %7, %cst_16 {dimension_numbers = #tpu.dot_dimension_numbers<[1], [0], [0], [1], [0, 0, 1, 1], [], []>} : vector<8x64xbf16>, vector<64x256xbf16>, vector<8x256xf32> -> vector<8x256xf32>
    %33 = arith.addf %30, %32 : vector<8x256xf32>
    %34 = vector.extract_strided_slice %33 {offsets = [0, 0], sizes = [8, 192], strides = [1, 1]} : vector<8x256xf32> to vector<8x192xf32>
    %35 = arith.negf %34 : vector<8x192xf32>
    %36 = math.exp %35 : vector<8x192xf32>
    %cst_17 = arith.constant 1.000000e+00 : f32
    %37 = vector.broadcast %cst_17 : f32 to vector<8x192xf32>
    %38 = arith.addf %37, %36 : vector<8x192xf32>
    %39 = arith.divf %37, %38 : vector<8x192xf32>
    %40 = vector.extract_strided_slice %33 {offsets = [0, 192], sizes = [8, 64], strides = [1, 1]} : vector<8x256xf32> to vector<8x64xf32>
    %41 = math.tanh %40 : vector<8x64xf32>
    %42 = vector.extract_strided_slice %39 {offsets = [0, 0], sizes = [8, 64], strides = [1, 1]} : vector<8x192xf32> to vector<8x64xf32>
    %43 = vector.extract_strided_slice %39 {offsets = [0, 64], sizes = [8, 64], strides = [1, 1]} : vector<8x192xf32> to vector<8x64xf32>
    %44 = vector.extract_strided_slice %39 {offsets = [0, 128], sizes = [8, 64], strides = [1, 1]} : vector<8x192xf32> to vector<8x64xf32>
    %45 = arith.mulf %43, %27 : vector<8x64xf32>
    %46 = arith.mulf %42, %41 : vector<8x64xf32>
    %47 = arith.addf %45, %46 : vector<8x64xf32>
    %48 = math.tanh %47 : vector<8x64xf32>
    %49 = arith.mulf %44, %48 : vector<8x64xf32>
    %c16 = arith.constant 16 : index
    %c0_18 = arith.constant 0 : index
    %50 = vector.load %arg9[%c16, %c0_18] : memref<64x256xf32, #tpu.memory_space<vmem>>, vector<8x256xf32>
    %51 = arith.truncf %49 : vector<8x64xf32> to vector<8x64xbf16>
    %cst_19 = arith.constant dense<0.000000e+00> : vector<8x256xf32>
    %52 = tpu.matmul %51, %7, %cst_19 {dimension_numbers = #tpu.dot_dimension_numbers<[1], [0], [0], [1], [0, 0, 1, 1], [], []>} : vector<8x64xbf16>, vector<64x256xbf16>, vector<8x256xf32> -> vector<8x256xf32>
    %53 = arith.addf %50, %52 : vector<8x256xf32>
    %54 = vector.extract_strided_slice %53 {offsets = [0, 0], sizes = [8, 192], strides = [1, 1]} : vector<8x256xf32> to vector<8x192xf32>
    %55 = arith.negf %54 : vector<8x192xf32>
    %56 = math.exp %55 : vector<8x192xf32>
    %cst_20 = arith.constant 1.000000e+00 : f32
    %57 = vector.broadcast %cst_20 : f32 to vector<8x192xf32>
    %58 = arith.addf %57, %56 : vector<8x192xf32>
    %59 = arith.divf %57, %58 : vector<8x192xf32>
    %60 = vector.extract_strided_slice %53 {offsets = [0, 192], sizes = [8, 64], strides = [1, 1]} : vector<8x256xf32> to vector<8x64xf32>
    %61 = math.tanh %60 : vector<8x64xf32>
    %62 = vector.extract_strided_slice %59 {offsets = [0, 0], sizes = [8, 64], strides = [1, 1]} : vector<8x192xf32> to vector<8x64xf32>
    %63 = vector.extract_strided_slice %59 {offsets = [0, 64], sizes = [8, 64], strides = [1, 1]} : vector<8x192xf32> to vector<8x64xf32>
    %64 = vector.extract_strided_slice %59 {offsets = [0, 128], sizes = [8, 64], strides = [1, 1]} : vector<8x192xf32> to vector<8x64xf32>
    %65 = arith.mulf %63, %47 : vector<8x64xf32>
    %66 = arith.mulf %62, %61 : vector<8x64xf32>
    %67 = arith.addf %65, %66 : vector<8x64xf32>
    %68 = math.tanh %67 : vector<8x64xf32>
    %69 = arith.mulf %64, %68 : vector<8x64xf32>
    %c24 = arith.constant 24 : index
    %c0_21 = arith.constant 0 : index
    %70 = vector.load %arg9[%c24, %c0_21] : memref<64x256xf32, #tpu.memory_space<vmem>>, vector<8x256xf32>
    %71 = arith.truncf %69 : vector<8x64xf32> to vector<8x64xbf16>
    %cst_22 = arith.constant dense<0.000000e+00> : vector<8x256xf32>
    %72 = tpu.matmul %71, %7, %cst_22 {dimension_numbers = #tpu.dot_dimension_numbers<[1], [0], [0], [1], [0, 0, 1, 1], [], []>} : vector<8x64xbf16>, vector<64x256xbf16>, vector<8x256xf32> -> vector<8x256xf32>
    %73 = arith.addf %70, %72 : vector<8x256xf32>
    %74 = vector.extract_strided_slice %73 {offsets = [0, 0], sizes = [8, 192], strides = [1, 1]} : vector<8x256xf32> to vector<8x192xf32>
    %75 = arith.negf %74 : vector<8x192xf32>
    %76 = math.exp %75 : vector<8x192xf32>
    %cst_23 = arith.constant 1.000000e+00 : f32
    %77 = vector.broadcast %cst_23 : f32 to vector<8x192xf32>
    %78 = arith.addf %77, %76 : vector<8x192xf32>
    %79 = arith.divf %77, %78 : vector<8x192xf32>
    %80 = vector.extract_strided_slice %73 {offsets = [0, 192], sizes = [8, 64], strides = [1, 1]} : vector<8x256xf32> to vector<8x64xf32>
    %81 = math.tanh %80 : vector<8x64xf32>
    %82 = vector.extract_strided_slice %79 {offsets = [0, 0], sizes = [8, 64], strides = [1, 1]} : vector<8x192xf32> to vector<8x64xf32>
    %83 = vector.extract_strided_slice %79 {offsets = [0, 64], sizes = [8, 64], strides = [1, 1]} : vector<8x192xf32> to vector<8x64xf32>
    %84 = vector.extract_strided_slice %79 {offsets = [0, 128], sizes = [8, 64], strides = [1, 1]} : vector<8x192xf32> to vector<8x64xf32>
    %85 = arith.mulf %83, %67 : vector<8x64xf32>
    %86 = arith.mulf %82, %81 : vector<8x64xf32>
    %87 = arith.addf %85, %86 : vector<8x64xf32>
    %88 = math.tanh %87 : vector<8x64xf32>
    %89 = arith.mulf %84, %88 : vector<8x64xf32>
    %c32 = arith.constant 32 : index
    %c0_24 = arith.constant 0 : index
    %90 = vector.load %arg9[%c32, %c0_24] : memref<64x256xf32, #tpu.memory_space<vmem>>, vector<8x256xf32>
    %91 = arith.truncf %89 : vector<8x64xf32> to vector<8x64xbf16>
    %cst_25 = arith.constant dense<0.000000e+00> : vector<8x256xf32>
    %92 = tpu.matmul %91, %7, %cst_25 {dimension_numbers = #tpu.dot_dimension_numbers<[1], [0], [0], [1], [0, 0, 1, 1], [], []>} : vector<8x64xbf16>, vector<64x256xbf16>, vector<8x256xf32> -> vector<8x256xf32>
    %93 = arith.addf %90, %92 : vector<8x256xf32>
    %94 = vector.extract_strided_slice %93 {offsets = [0, 0], sizes = [8, 192], strides = [1, 1]} : vector<8x256xf32> to vector<8x192xf32>
    %95 = arith.negf %94 : vector<8x192xf32>
    %96 = math.exp %95 : vector<8x192xf32>
    %cst_26 = arith.constant 1.000000e+00 : f32
    %97 = vector.broadcast %cst_26 : f32 to vector<8x192xf32>
    %98 = arith.addf %97, %96 : vector<8x192xf32>
    %99 = arith.divf %97, %98 : vector<8x192xf32>
    %100 = vector.extract_strided_slice %93 {offsets = [0, 192], sizes = [8, 64], strides = [1, 1]} : vector<8x256xf32> to vector<8x64xf32>
    %101 = math.tanh %100 : vector<8x64xf32>
    %102 = vector.extract_strided_slice %99 {offsets = [0, 0], sizes = [8, 64], strides = [1, 1]} : vector<8x192xf32> to vector<8x64xf32>
    %103 = vector.extract_strided_slice %99 {offsets = [0, 64], sizes = [8, 64], strides = [1, 1]} : vector<8x192xf32> to vector<8x64xf32>
    %104 = vector.extract_strided_slice %99 {offsets = [0, 128], sizes = [8, 64], strides = [1, 1]} : vector<8x192xf32> to vector<8x64xf32>
    %105 = arith.mulf %103, %87 : vector<8x64xf32>
    %106 = arith.mulf %102, %101 : vector<8x64xf32>
    %107 = arith.addf %105, %106 : vector<8x64xf32>
    %108 = math.tanh %107 : vector<8x64xf32>
    %109 = arith.mulf %104, %108 : vector<8x64xf32>
    %c40 = arith.constant 40 : index
    %c0_27 = arith.constant 0 : index
    %110 = vector.load %arg9[%c40, %c0_27] : memref<64x256xf32, #tpu.memory_space<vmem>>, vector<8x256xf32>
    %111 = arith.truncf %109 : vector<8x64xf32> to vector<8x64xbf16>
    %cst_28 = arith.constant dense<0.000000e+00> : vector<8x256xf32>
    %112 = tpu.matmul %111, %7, %cst_28 {dimension_numbers = #tpu.dot_dimension_numbers<[1], [0], [0], [1], [0, 0, 1, 1], [], []>} : vector<8x64xbf16>, vector<64x256xbf16>, vector<8x256xf32> -> vector<8x256xf32>
    %113 = arith.addf %110, %112 : vector<8x256xf32>
    %114 = vector.extract_strided_slice %113 {offsets = [0, 0], sizes = [8, 192], strides = [1, 1]} : vector<8x256xf32> to vector<8x192xf32>
    %115 = arith.negf %114 : vector<8x192xf32>
    %116 = math.exp %115 : vector<8x192xf32>
    %cst_29 = arith.constant 1.000000e+00 : f32
    %117 = vector.broadcast %cst_29 : f32 to vector<8x192xf32>
    %118 = arith.addf %117, %116 : vector<8x192xf32>
    %119 = arith.divf %117, %118 : vector<8x192xf32>
    %120 = vector.extract_strided_slice %113 {offsets = [0, 192], sizes = [8, 64], strides = [1, 1]} : vector<8x256xf32> to vector<8x64xf32>
    %121 = math.tanh %120 : vector<8x64xf32>
    %122 = vector.extract_strided_slice %119 {offsets = [0, 0], sizes = [8, 64], strides = [1, 1]} : vector<8x192xf32> to vector<8x64xf32>
    %123 = vector.extract_strided_slice %119 {offsets = [0, 64], sizes = [8, 64], strides = [1, 1]} : vector<8x192xf32> to vector<8x64xf32>
    %124 = vector.extract_strided_slice %119 {offsets = [0, 128], sizes = [8, 64], strides = [1, 1]} : vector<8x192xf32> to vector<8x64xf32>
    %125 = arith.mulf %123, %107 : vector<8x64xf32>
    %126 = arith.mulf %122, %121 : vector<8x64xf32>
    %127 = arith.addf %125, %126 : vector<8x64xf32>
    %128 = math.tanh %127 : vector<8x64xf32>
    %129 = arith.mulf %124, %128 : vector<8x64xf32>
    %c48 = arith.constant 48 : index
    %c0_30 = arith.constant 0 : index
    %130 = vector.load %arg9[%c48, %c0_30] : memref<64x256xf32, #tpu.memory_space<vmem>>, vector<8x256xf32>
    %131 = arith.truncf %129 : vector<8x64xf32> to vector<8x64xbf16>
    %cst_31 = arith.constant dense<0.000000e+00> : vector<8x256xf32>
    %132 = tpu.matmul %131, %7, %cst_31 {dimension_numbers = #tpu.dot_dimension_numbers<[1], [0], [0], [1], [0, 0, 1, 1], [], []>} : vector<8x64xbf16>, vector<64x256xbf16>, vector<8x256xf32> -> vector<8x256xf32>
    %133 = arith.addf %130, %132 : vector<8x256xf32>
    %134 = vector.extract_strided_slice %133 {offsets = [0, 0], sizes = [8, 192], strides = [1, 1]} : vector<8x256xf32> to vector<8x192xf32>
    %135 = arith.negf %134 : vector<8x192xf32>
    %136 = math.exp %135 : vector<8x192xf32>
    %cst_32 = arith.constant 1.000000e+00 : f32
    %137 = vector.broadcast %cst_32 : f32 to vector<8x192xf32>
    %138 = arith.addf %137, %136 : vector<8x192xf32>
    %139 = arith.divf %137, %138 : vector<8x192xf32>
    %140 = vector.extract_strided_slice %133 {offsets = [0, 192], sizes = [8, 64], strides = [1, 1]} : vector<8x256xf32> to vector<8x64xf32>
    %141 = math.tanh %140 : vector<8x64xf32>
    %142 = vector.extract_strided_slice %139 {offsets = [0, 0], sizes = [8, 64], strides = [1, 1]} : vector<8x192xf32> to vector<8x64xf32>
    %143 = vector.extract_strided_slice %139 {offsets = [0, 64], sizes = [8, 64], strides = [1, 1]} : vector<8x192xf32> to vector<8x64xf32>
    %144 = vector.extract_strided_slice %139 {offsets = [0, 128], sizes = [8, 64], strides = [1, 1]} : vector<8x192xf32> to vector<8x64xf32>
    %145 = arith.mulf %143, %127 : vector<8x64xf32>
    %146 = arith.mulf %142, %141 : vector<8x64xf32>
    %147 = arith.addf %145, %146 : vector<8x64xf32>
    %148 = math.tanh %147 : vector<8x64xf32>
    %149 = arith.mulf %144, %148 : vector<8x64xf32>
    %c56 = arith.constant 56 : index
    %c0_33 = arith.constant 0 : index
    %150 = vector.load %arg9[%c56, %c0_33] : memref<64x256xf32, #tpu.memory_space<vmem>>, vector<8x256xf32>
    %151 = arith.truncf %149 : vector<8x64xf32> to vector<8x64xbf16>
    %cst_34 = arith.constant dense<0.000000e+00> : vector<8x256xf32>
    %152 = tpu.matmul %151, %7, %cst_34 {dimension_numbers = #tpu.dot_dimension_numbers<[1], [0], [0], [1], [0, 0, 1, 1], [], []>} : vector<8x64xbf16>, vector<64x256xbf16>, vector<8x256xf32> -> vector<8x256xf32>
    %153 = arith.addf %150, %152 : vector<8x256xf32>
    %154 = vector.extract_strided_slice %153 {offsets = [0, 0], sizes = [8, 192], strides = [1, 1]} : vector<8x256xf32> to vector<8x192xf32>
    %155 = arith.negf %154 : vector<8x192xf32>
    %156 = math.exp %155 : vector<8x192xf32>
    %cst_35 = arith.constant 1.000000e+00 : f32
    %157 = vector.broadcast %cst_35 : f32 to vector<8x192xf32>
    %158 = arith.addf %157, %156 : vector<8x192xf32>
    %159 = arith.divf %157, %158 : vector<8x192xf32>
    %160 = vector.extract_strided_slice %153 {offsets = [0, 192], sizes = [8, 64], strides = [1, 1]} : vector<8x256xf32> to vector<8x64xf32>
    %161 = math.tanh %160 : vector<8x64xf32>
    %162 = vector.extract_strided_slice %159 {offsets = [0, 0], sizes = [8, 64], strides = [1, 1]} : vector<8x192xf32> to vector<8x64xf32>
    %163 = vector.extract_strided_slice %159 {offsets = [0, 64], sizes = [8, 64], strides = [1, 1]} : vector<8x192xf32> to vector<8x64xf32>
    %164 = vector.extract_strided_slice %159 {offsets = [0, 128], sizes = [8, 64], strides = [1, 1]} : vector<8x192xf32> to vector<8x64xf32>
    %165 = arith.mulf %163, %147 : vector<8x64xf32>
    %166 = arith.mulf %162, %161 : vector<8x64xf32>
    %167 = arith.addf %165, %166 : vector<8x64xf32>
    %168 = math.tanh %167 : vector<8x64xf32>
    %169 = arith.mulf %164, %168 : vector<8x64xf32>
    %c0_36 = arith.constant 0 : index
    %c0_37 = arith.constant 0 : index
    %170 = vector.load %arg4[%c0_36, %c0_37] : memref<64x64xf32, #tpu.memory_space<vmem>>, vector<64x64xf32>
    %cst_38 = arith.constant dense<0.000000e+00> : vector<8x64xf32>
    %171 = tpu.matmul %169, %170, %cst_38 {dimension_numbers = #tpu.dot_dimension_numbers<[1], [0], [0], [1], [0, 0, 1, 1], [], []>} : vector<8x64xf32>, vector<64x64xf32>, vector<8x64xf32> -> vector<8x64xf32>
    %c0_39 = arith.constant 0 : index
    %c0_40 = arith.constant 0 : index
    %172 = vector.load %arg5[%c0_39, %c0_40] : memref<1x64xf32, #tpu.memory_space<vmem>>, vector<1x64xf32>
    %173 = vector.broadcast %172 : vector<1x64xf32> to vector<8x64xf32>
    %174 = arith.addf %171, %173 : vector<8x64xf32>
    %cst_41 = arith.constant 0.000000e+00 : f32
    %175 = vector.broadcast %cst_41 : f32 to vector<8x64xf32>
    %176 = arith.maximumf %174, %175 : vector<8x64xf32>
    %c0_42 = arith.constant 0 : index
    %c0_43 = arith.constant 0 : index
    %177 = vector.load %arg6[%c0_42, %c0_43] : memref<64x128xf32, #tpu.memory_space<vmem>>, vector<64x128xf32>
    %cst_44 = arith.constant dense<0.000000e+00> : vector<8x128xf32>
    %178 = tpu.matmul %176, %177, %cst_44 {dimension_numbers = #tpu.dot_dimension_numbers<[1], [0], [0], [1], [0, 0, 1, 1], [], []>} : vector<8x64xf32>, vector<64x128xf32>, vector<8x128xf32> -> vector<8x128xf32>
    %c0_45 = arith.constant 0 : index
    %c0_46 = arith.constant 0 : index
    %179 = vector.load %arg7[%c0_45, %c0_46] : memref<1x128xf32, #tpu.memory_space<vmem>>, vector<1x128xf32>
    %180 = vector.broadcast %179 : vector<1x128xf32> to vector<8x128xf32>
    %181 = arith.addf %178, %180 : vector<8x128xf32>
    %182 = arith.negf %181 : vector<8x128xf32>
    %183 = math.exp %182 : vector<8x128xf32>
    %cst_47 = arith.constant 1.000000e+00 : f32
    %184 = vector.broadcast %cst_47 : f32 to vector<8x128xf32>
    %185 = arith.addf %184, %183 : vector<8x128xf32>
    %186 = arith.divf %184, %185 : vector<8x128xf32>
    %c0_48 = arith.constant 0 : index
    %c0_49 = arith.constant 0 : index
    %187 = vector.load %arg8[%c0_48, %c0_49] : memref<8x128xf32, #tpu.memory_space<vmem>>, vector<8x128xf32>
    tpu.vector_store %arg8[%c0_48, %c0_49], %186 {strides = array<i32>} : memref<8x128xf32, #tpu.memory_space<vmem>>, vector<8x128xf32>,
    return
  }
}

</mosaic_0001>

<bundles_post_ra>
// kernel: rnn_forward.1
= control target key start
LH: loop header
LB: loop body
LE: loop exit
PB: predicated region body
PF: predicated region fallthrough
CT: control target
= control target key end

     0   :  { %13 = vsyncpa [#allocation4], 0  ;;  %s1773_s0 = inlined_call_operand.vmem [shape: bf16[64,24], index: 0, kind: input, shape index: {}]   ;;  %s1774_s1 = inlined_call_operand.hbm [shape: bf16[24,256], index: 1, kind: input, shape index: {}]   ;;  %s1775_s2 = inlined_call_operand.vmem [shape: bf16[64,256], index: 2, kind: input, shape index: {}]   ;;  %s1776_s3 = inlined_call_operand.vmem [shape: f32[1,256], index: 3, kind: input, shape index: {}]   ;;  %s1777_s4 = inlined_call_operand.hbm [shape: f32[64,64], index: 4, kind: input, shape index: {}]   ;;  %s1778_s5 = inlined_call_operand.vmem [shape: f32[1,64], index: 5, kind: input, shape index: {}]   ;;  %s1779_s6 = inlined_call_operand.hbm [shape: f32[64,128], index: 6, kind: input, shape index: {}]   ;;  %s1780_s7 = inlined_call_operand.vmem [shape: f32[1,128], index: 7, kind: input, shape index: {}]   ;;  %s1781_s8 = inlined_call_operand.vmem [shape: f32[8,128], index: 8, kind: output, shape index: {}]  }
   0x1   :  { %14 = vsyncpa [#allocation6], 0  ;;  %s1438_s27 = smov [#allocation5]   ;;  %s1439_s29 = smov [#allocation3]  }
   0x2   :  { %s38_s28 = sshll.u32 %s1438_s27, 4  ;;  %s22_s30 = sshll.u32 %s1439_s29, 4  ;;  %s39_s28 = int_to_ptr.vmem [resolvable:$true] %s38_s28  ;;  %s1493_s30 = int_to_ptr.vmem [resolvable:$true] %s22_s30 }
   0x3   :  { %s1368_s11 = scalar_lea.hbm %s1777_s4, 1024 }
   0x4   :  { %p1369_p0 = scmp.ne.s32.totalorder %s1777_s4, %s1368_s11  ;;  %p1372_p1 = scmp.lt.u32.totalorder %s1368_s11, %s1777_s4 }
   0x6   :  { %p1374_p2 = pnand %p1372_p1, %p1369_p0 }
   0x8   :  { %1377 = shalt.err (!%p1374_p2)
}
   0x9   :  { %s1378_s16 = scalar_lea.vmem %s39_s28, 1024  ;;  %p1383_p4 = scmp.lt.s32.totalorder %s39_s28, %s39_s28 }
   0xa   :  { %p1379_p3 = scmp.ne.s32.totalorder %s39_s28, %s1378_s16  ;;  %p1384_p5 = scmp.lt.s32.totalorder %s1378_s16, %s1378_s16 }
   0xc   :  { %p1385_p6 = por %p1384_p5, %p1383_p4 }
   0xe   :  { %p1386_p7 = pnand %p1385_p6, %p1379_p3 }
  0x10   :  { %1389 = shalt.err (!%p1386_p7)
}
  0x11   :  { %s1440_s17 = smov 128   ;;  %s1441_s18 = smov 8  }
  0x12   :  { %44 = dma.hbm_to_vmem [thread:$0]  %s1777_s4, 1024, %s39_s28, [#allocation6], %s1440_s17, %s1440_s17, %s1441_s18  }
  0x13   :  { %s1390_s23 = scalar_lea.hbm %s1774_s1, 384 }
  0x14   :  { %p1391_p8 = scmp.ne.s32.totalorder %s1774_s1, %s1390_s23  ;;  %p1394_p9 = scmp.lt.u32.totalorder %s1390_s23, %s1774_s1 }
  0x16   :  { %p1396_p10 = pnand %p1394_p9, %p1391_p8 }
  0x18   :  { %1399 = shalt.err (!%p1396_p10)
}
  0x19   :  { %s1400_s29 = scalar_lea.vmem %s1493_s30, 384  ;;  %p1405_p12 = scmp.lt.s32.totalorder %s1493_s30, %s1493_s30 }
  0x1a   :  { %p1401_p11 = scmp.ne.s32.totalorder %s1493_s30, %s1400_s29  ;;  %p1406_p13 = scmp.lt.s32.totalorder %s1400_s29, %s1400_s29 }
  0x1c   :  { %p1407_p0 = por %p1406_p13, %p1405_p12 }
  0x1e   :  { %p1408_p1 = pnand %p1407_p0, %p1401_p11 }
  0x20   :  { %1411 = shalt.err (!%p1408_p1)
}
  0x21   :  { %28 = dma.hbm_to_vmem [thread:$0]  %s1774_s1, 384, %s1493_s30, [#allocation4], %s1440_s17, %s1440_s17, %s1441_s18  }
  0x22   :  { %s1442_s9 = smov [#allocation7]   ;;  %s1412_s13 = scalar_lea.hbm %s1779_s6, 1024 }
  0x23   :  { %s52_s10 = sshll.u32 %s1442_s9, 4  ;;  %p1413_p2 = scmp.ne.s32.totalorder %s1779_s6, %s1412_s13  ;;  %s53_s10 = int_to_ptr.vmem [resolvable:$true] %s52_s10 }
  0x24   :  { %p1416_p3 = scmp.lt.u32.totalorder %s1412_s13, %s1779_s6 }
  0x26   :  { %p1418_p4 = pnand %p1416_p3, %p1413_p2 }
  0x28   :  { %1421 = shalt.err (!%p1418_p4)
}
  0x29   :  { %s1422_s20 = scalar_lea.vmem %s53_s10, 1024  ;;  %p1427_p6 = scmp.lt.s32.totalorder %s53_s10, %s53_s10 }
  0x2a   :  { %p1423_p5 = scmp.ne.s32.totalorder %s53_s10, %s1422_s20  ;;  %p1428_p7 = scmp.lt.s32.totalorder %s1422_s20, %s1422_s20 }
  0x2c   :  { %p1429_p8 = por %p1428_p7, %p1427_p6 }
  0x2e   :  { %p1430_p9 = pnand %p1429_p8, %p1423_p5 }
  0x30   :  { %1433 = shalt.err (!%p1430_p9)
}
  0x31   :  { %58 = dma.hbm_to_vmem [thread:$0]  %s1779_s6, 1024, %s53_s10, [#allocation6], %s1440_s17, %s1440_s17, %s1441_s18  }
  0x32   :  { %1434 = dma.done.wait [#allocation4], 384  }
  0x33   :  { %1435 = vsyncadd [#allocation4], 4294966912 }
  0x34   :  { %1436 = dma.done.wait [#allocation6], 2048  }
  0x35   :  { %1437 = vsyncadd [#allocation6], 4294965248  ;;  %v1443_v0 = vmov 0   ;;  %v1550_v1 = vld [vmem:[%s1775_s2 + $0x4] ss:$8 sps:$4 sm:$0xff]   ;;  %v81_v7 = vld [vmem:[#allocation3 + $0x10] sm:$0xff]  ;;  %v84_v16 = vlaneseq }
  0x36   :  { %181 = vmatprep.mubr.bf16.mxu0 %v1443_v0  ;;  %324 = vmatprep.mubr.bf16.mxu1 %v1443_v0  ;;  %v1555_v2 = vld [vmem:[%s1775_s2] ss:$8 sps:$4 sm:$0xff]   ;;  %v1250_v3 = vld [vmem:[#allocation3 + $0x4] ss:$8 sps:$4 sm:$0xff]   ;;  %v1562_v5 = vld [vmem:[%s1775_s2 + $0x14] ss:$8 sps:$4 sm:$0xff]   ;;  %v1115_v8 = vcombine.high %v81_v7, %v81_v7  ;;  %v1114_v9 = vcombine.low %v81_v7, %v81_v7 }
  0x37   :  { %292 = vmatprep.subr.bf16.mxu1 %v1550_v1  ;;  %v1252_v4 = vld [vmem:[#allocation3] ss:$8 sps:$4 sm:$0xff]   ;;  %v1567_v6 = vld [vmem:[%s1775_s2 + $0x10] ss:$8 sps:$4 sm:$0xff]   ;;  %149 = vmatprep.subr.bf16.mxu0 %v1250_v3  ;;  %vm142_vm0 = vcmask 1043456   ;;  %vm129_vm1 = vcmask 195584  }
  0x38   :  { %293 = vmatpush1.bf16.msra.mxu1 %v1555_v2  ;;  %150 = vmatpush1.bf16.msra.mxu0 %v1252_v4  ;;  %v1573_v10 = vld [vmem:[%s1775_s2 + $0x24] ss:$8 sps:$4 sm:$0xff]   ;;  %v144_v11 = vsel %vm142_vm0, %v1114_v9, 0  ;;  %v1579_v12 = vld [vmem:[%s1775_s2 + $0x20] ss:$8 sps:$4 sm:$0xff]   ;;  %v85_v17 = vshrl.u32 %v84_v16, 7 }
  0x39   :  { %294 = vmatprep.subr.bf16.mxu1 %v1562_v5  ;;  %1116 = vmatprep.subr.msk.bf16.mxu0 %vm142_vm0, %v1115_v8  ;;  %v1261_v13 = vld [vmem:[%s1773_s0] sm:$0xff]   ;;  %v1588_v14 = vld [vmem:[%s1775_s2 + $0x34] ss:$8 sps:$4 sm:$0xff]   ;;  %v1595_v15 = vld [vmem:[%s1775_s2 + $0x30] ss:$8 sps:$4 sm:$0xff]   ;;  %vm288_vm2 = vcmask 523264  }
  0x3a   :  { %v86_v18 = vsub.s32 0, %v85_v17  ;;  %v82_v19 = vld [vmem:[%s1776_s3] sm:$0x3]  ;;  %v90_v20 = vsub.s32 1, %v85_v17  ;;  %s1444_s3 = smov 64   ;;  %v1265_v9 = vld [vmem:[%s1773_s0 + $0x8] sm:$0xff]  }
  0x3b   :  { %vm1446_vm3 = vmmov 0  }
  0x3c   :  { %295 = vmatpush1.bf16.msra.mxu1 %v1567_v6  ;;  %152 = vmatpush1.bf16.msra.mxu0 %v144_v11  ;;  %v1623_v21 = vrot.slane %v82_v19, %v86_v18  ;;  %v1625_v23 = vrot.slane %v82_v19, %v90_v20  ;;  %v1266_v11 = vld [vmem:[%s1773_s0 + $0x10] sm:$0xff]  }
  0x3d   :  { %296 = vmatprep.subr.bf16.mxu1 %v1573_v10  ;;  %450 = vmatprep.subr.bf16.mxu0 %v1550_v1 }
  0x3f   :  { %1117 = vmatmul.mubr.msk.bf16.vlgmr.msra.gmra.mrb[0].mxu0 %vm129_vm1, %v1261_v13  ;;  %v1267_v13 = vld [vmem:[%s1773_s0 + $0x18] sm:$0xff]  }
  0x40   :  { %297 = vmatpush1.bf16.msra.mxu1 %v1579_v12  ;;  %451 = vmatpush1.bf16.msra.mxu0 %v1555_v2 }
  0x41   :  { %298 = vmatprep.subr.bf16.mxu1 %v1588_v14  ;;  %191 = vmatprep.mubr.bf16.mxu0 %v1443_v0 }
  0x42   :  { %452 = vmatprep.subr.bf16.mxu0 %v1562_v5 }
  0x44   :  { %299 = vmatpush1.bf16.msra.mxu1 %v1595_v15  ;;  %453 = vmatpush1.bf16.msra.mxu0 %v1567_v6 }
  0x45   :  { %371 = vmatprep.subr.bf16.mxu1 %v1550_v1  ;;  %454 = vmatprep.subr.bf16.mxu0 %v1573_v10 }
  0x47   :  { %325 = vmatmul.mubr.bf16.vlgmr.msra.gmra.mrb[0].mxu1 %v1443_v0  ;;  %1118 = vmatmul.mubr.msk.bf16.gmra.mrb[4].mxu0 %vm129_vm1, %v1265_v9 }
  0x48   :  { %372 = vmatpush1.bf16.msra.mxu1 %v1555_v2  ;;  %403 = vmatprep.mubr.bf16.mxu1 %v1443_v0 }
  0x49   :  { %373 = vmatprep.subr.bf16.mxu1 %v1562_v5  ;;  %455 = vmatpush1.bf16.msra.mxu0 %v1579_v12 }
  0x4a   :  { %456 = vmatprep.subr.bf16.mxu0 %v1588_v14  ;;  %201 = vmatprep.mubr.bf16.mxu0 %v1443_v0 }
  0x4c   :  { %374 = vmatpush1.bf16.msra.mxu1 %v1567_v6 }
  0x4d   :  { %375 = vmatprep.subr.bf16.mxu1 %v1573_v10  ;;  %457 = vmatpush1.bf16.msra.mxu0 %v1595_v15 }
  0x4e   :  { %608 = vmatprep.subr.bf16.mxu0 %v1550_v1 }
  0x4f   :  { %1119 = vmatmul.mubr.msk.bf16.gmra.mrb[8].mxu0 %vm129_vm1, %v1266_v11 }
  0x50   :  { %376 = vmatpush1.bf16.msra.mxu1 %v1579_v12  ;;  %211 = vmatprep.mubr.bf16.mxu0 %v1443_v0 }
  0x51   :  { %377 = vmatprep.subr.bf16.mxu1 %v1588_v14 }
  0x54   :  { %378 = vmatpush1.bf16.msra.mxu1 %v1595_v15 }
  0x55   :  { %529 = vmatprep.subr.bf16.mxu1 %v1550_v1 }
  0x57   :  { %1120 = vmatmul.mubr.msk.bf16.gmra.mrb[12].mxu0 %vm129_vm1, %v1267_v13 }
  0x58   :  { %482 = vmatprep.mubr.bf16.mxu0 %v1443_v0 }
 0x112   :  { %v183_v22 = vpop.f32.mrb[0].mxu0 }
 0x113   :  { %v185_v24 = vpop.f32.mrb[1].mxu0  ;;  %v184_v26 = vadd.f32 %v183_v22, %v1623_v21 }
 0x114   :  { %v187_v25 = vpop.f32.mrb[2].mxu0  ;;  %v186_v28 = vadd.f32 %v185_v24, %v1625_v23 }
 0x115   :  { %v189_v27 = vpop.f32.mrb[3].mxu0  ;;  %v188_v53 = vadd.f32 %v187_v25, %v1623_v21 }
 0x116   :  { %v190_v54 = vadd.f32 %v189_v27, %v1625_v23 }
 0x11a   :  { %v326_v29 = vpop.f32.mrb[0].mxu1  ;;  %v193_v22 = vpop.f32.mrb[4].mxu0 }
 0x11b   :  { %v333_v30 = vadd.f32 %v326_v29, %v184_v26  ;;  %v328_v31 = vpop.f32.mrb[1].mxu1  ;;  %v195_v24 = vpop.f32.mrb[5].mxu0 }
 0x11c   :  { %v334_v32 = vadd.f32 %v328_v31, %v186_v28  ;;  %v330_v33 = vpop.f32.mrb[2].mxu1  ;;  %v1662_v25 = vpop.f32.mrb[6].mxu0 }
 0x11d   :  { %v331_v34 = vpop.f32.mrb[3].mxu1  ;;  %v1129_v36 = vmul.f32 -1.442695, %v333_v30  ;;  %v1664_v26 = vpop.f32.mrb[7].mxu0 }
 0x11e   :  { %1268 = vtanh.f32 %v334_v32  ;;  %v1130_v46 = vmul.f32 -1.442695, %v334_v32  ;;  %v200_v9 = vadd.f32 %v1664_v26, %v1625_v23 }
 0x11f   :  { %1270 = vpow2.f32 %v1129_v36 }
 0x122   :  { %v1666_v27 = vpop.f32.mrb[8].mxu0 }
 0x123   :  { %v1668_v28 = vpop.f32.mrb[9].mxu0 }
 0x124   :  { %v1670_v29 = vpop.f32.mrb[10].mxu0 }
 0x125   :  { %v1672_v30 = vpop.f32.mrb[11].mxu0 }
 0x128   :  { %v1269_v35 = vpop.eup %1268 }
 0x129   :  { %350 = vrot.lane.b32.xlu0 %v1269_v35, %s1444_s3  ;;  %v1271_v37 = vpop.eup %1270 }
 0x12a   :  { %v341_v38 = vadd.f32 1.0, %v1271_v37  ;;  %v1674_v33 = vpop.f32.mrb[12].mxu0 }
 0x12b   :  { %v1676_v34 = vpop.f32.mrb[13].mxu0 }
 0x12c   :  { %1272 = vrcp.f32 %v341_v38  ;;  %v1678_v35 = vpop.f32.mrb[14].mxu0 }
 0x12d   :  { %v1680_v36 = vpop.f32.mrb[15].mxu0 }
 0x136   :  { %v1273_v39 = vpop.eup %1272 }
 0x137   :  { %v348_v42 = vmul.f32 0.0, %v1273_v39 }
 0x19b   :  { %v351_v40 = vpop.permute.xlu0 %350 }
 0x19c   :  { %v353_v41 = vmul.f32 %v1273_v39, %v351_v40 }
 0x19e   :  { %355 = vrot.lane.b32.xlu0 %v353_v41, %s1444_s3  ;;  %v194_v41 = vadd.f32 %v193_v22, %v1623_v21 }
 0x210   :  { %v356_v43 = vpop.permute.xlu0 %355 }
 0x211   :  { %v358_v44 = vadd.f32 %v356_v43, %v348_v42  ;;  %v196_v42 = vadd.f32 %v195_v24, %v1625_v23 }
 0x213   :  { %1274 = vtanh.f32 %v358_v44 }
 0x214   :  { %1276 = vpow2.f32 %v1130_v46 }
 0x21d   :  { %v1275_v45 = vpop.eup %1274 }
 0x21e   :  { %361 = vrot.lane.b32.xlu1 %v1275_v45, %s1444_s3  ;;  %v1277_v47 = vpop.eup %1276 }
 0x21f   :  { %v342_v48 = vadd.f32 1.0, %v1277_v47 }
 0x221   :  { %1278 = vrcp.f32 %v342_v48 }
 0x22b   :  { %v1279_v49 = vpop.eup %1278 }
 0x290   :  { %v362_v50 = vpop.permute.xlu1 %361 }
 0x291   :  { %v364_v51 = vmul.f32 %v1279_v49, %v362_v50 }
 0x293   :  { %v367_v52 = vpack.c.bf16 %v364_v51, %v364_v51 }
 0x295   :  { %1131 = vmatmul.mubr.msk.bf16.vlgmr.msra.gmra.mrb[4].mxu1 %vm288_vm2, %v367_v52 }
 0x296   :  { %530 = vmatpush1.bf16.msra.mxu1 %v1555_v2  ;;  %561 = vmatprep.mubr.bf16.mxu1 %v1443_v0 }
 0x297   :  { %531 = vmatprep.subr.bf16.mxu1 %v1562_v5 }
 0x29a   :  { %532 = vmatpush1.bf16.msra.mxu1 %v1567_v6 }
 0x29b   :  { %533 = vmatprep.subr.bf16.mxu1 %v1573_v10 }
 0x29e   :  { %534 = vmatpush1.bf16.msra.mxu1 %v1579_v12 }
 0x29f   :  { %535 = vmatprep.subr.bf16.mxu1 %v1588_v14 }
 0x2a2   :  { %536 = vmatpush1.bf16.msra.mxu1 %v1595_v15 }
 0x2a3   :  { %687 = vmatprep.subr.bf16.mxu1 %v1550_v1 }
 0x368   :  { %v405_v55 = vpop.f32.mrb[4].mxu1 }
 0x369   :  { %v412_v56 = vadd.f32 %v405_v55, %v188_v53  ;;  %v407_v57 = vpop.f32.mrb[5].mxu1 }
 0x36a   :  { %v413_v58 = vadd.f32 %v407_v57, %v190_v54  ;;  %v409_v59 = vpop.f32.mrb[6].mxu1 }
 0x36b   :  { %v410_v60 = vpop.f32.mrb[7].mxu1  ;;  %v1132_v62 = vmul.f32 -1.442695, %v412_v56 }
 0x36c   :  { %1280 = vtanh.f32 %v413_v58  ;;  %v1133_v20 = vmul.f32 -1.442695, %v413_v58 }
 0x36d   :  { %1282 = vpow2.f32 %v1132_v62 }
 0x376   :  { %v1281_v61 = vpop.eup %1280 }
 0x377   :  { %429 = vrot.lane.b32.xlu1 %v1281_v61, %s1444_s3  ;;  %v1283_v63 = vpop.eup %1282 }
 0x378   :  { %v420_v3 = vadd.f32 1.0, %v1283_v63 }
 0x37a   :  { %1284 = vrcp.f32 %v420_v3 }
 0x384   :  { %v1285_v4 = vpop.eup %1284 }
 0x385   :  { %v427_v16 = vmul.f32 %v1285_v4, %v358_v44 }
 0x3e9   :  { %v430_v7 = vpop.permute.xlu1 %429 }
 0x3ea   :  { %v432_v8 = vmul.f32 %v1285_v4, %v430_v7 }
 0x3ec   :  { %434 = vrot.lane.b32.xlu0 %v432_v8, %s1444_s3  ;;  %v198_v8 = vadd.f32 %v1662_v25, %v1623_v21 }
 0x45e   :  { %v435_v17 = vpop.permute.xlu0 %434 }
 0x45f   :  { %v437_v18 = vadd.f32 %v435_v17, %v427_v16 }
 0x461   :  { %1286 = vtanh.f32 %v437_v18 }
 0x462   :  { %1288 = vpow2.f32 %v1133_v20 }
 0x46b   :  { %v1287_v19 = vpop.eup %1286 }
 0x46c   :  { %440 = vrot.lane.b32.xlu1 %v1287_v19, %s1444_s3  ;;  %v1289_v31 = vpop.eup %1288 }
 0x46d   :  { %v421_v32 = vadd.f32 1.0, %v1289_v31 }
 0x46f   :  { %1290 = vrcp.f32 %v421_v32 }
 0x479   :  { %v1291_v37 = vpop.eup %1290 }
 0x4de   :  { %v441_v38 = vpop.permute.xlu1 %440 }
 0x4df   :  { %v443_v39 = vmul.f32 %v1291_v37, %v441_v38 }
 0x4e1   :  { %v446_v40 = vpack.c.bf16 %v443_v39, %v443_v39 }
 0x4e3   :  { %1134 = vmatmul.mubr.msk.bf16.vlgmr.msra.gmra.mrb[16].mxu0 %vm288_vm2, %v446_v40 }
 0x4e4   :  { %609 = vmatpush1.bf16.msra.mxu0 %v1555_v2  ;;  %640 = vmatprep.mubr.bf16.mxu0 %v1443_v0 }
 0x4e5   :  { %610 = vmatprep.subr.bf16.mxu0 %v1562_v5 }
 0x4e8   :  { %611 = vmatpush1.bf16.msra.mxu0 %v1567_v6 }
 0x4e9   :  { %612 = vmatprep.subr.bf16.mxu0 %v1573_v10 }
 0x4ec   :  { %613 = vmatpush1.bf16.msra.mxu0 %v1579_v12 }
 0x4ed   :  { %614 = vmatprep.subr.bf16.mxu0 %v1588_v14 }
 0x4f0   :  { %615 = vmatpush1.bf16.msra.mxu0 %v1595_v15 }
 0x4f1   :  { %766 = vmatprep.subr.bf16.mxu0 %v1550_v1 }
 0x5b6   :  { %v484_v43 = vpop.f32.mrb[16].mxu0 }
 0x5b7   :  { %v491_v44 = vadd.f32 %v484_v43, %v194_v41  ;;  %v486_v45 = vpop.f32.mrb[17].mxu0 }
 0x5b8   :  { %v492_v46 = vadd.f32 %v486_v45, %v196_v42  ;;  %v488_v47 = vpop.f32.mrb[18].mxu0 }
 0x5b9   :  { %v489_v48 = vpop.f32.mrb[19].mxu0  ;;  %v1135_v50 = vmul.f32 -1.442695, %v491_v44  ;;  %v204_v47 = vadd.f32 %v1666_v27, %v1623_v21 }
 0x5ba   :  { %1292 = vtanh.f32 %v492_v46  ;;  %v1136_v60 = vmul.f32 -1.442695, %v492_v46  ;;  %v206_v48 = vadd.f32 %v1668_v28, %v1625_v23 }
 0x5bb   :  { %1294 = vpow2.f32 %v1135_v50 }
 0x5c4   :  { %v1293_v49 = vpop.eup %1292 }
 0x5c5   :  { %508 = vrot.lane.b32.xlu0 %v1293_v49, %s1444_s3  ;;  %v1295_v51 = vpop.eup %1294 }
 0x5c6   :  { %v499_v52 = vadd.f32 1.0, %v1295_v51 }
 0x5c8   :  { %1296 = vrcp.f32 %v499_v52 }
 0x5d2   :  { %v1297_v53 = vpop.eup %1296 }
 0x5d3   :  { %v506_v56 = vmul.f32 %v1297_v53, %v437_v18 }
 0x637   :  { %v509_v54 = vpop.permute.xlu0 %508 }
 0x638   :  { %v511_v55 = vmul.f32 %v1297_v53, %v509_v54 }
 0x63a   :  { %513 = vrot.lane.b32.xlu1 %v511_v55, %s1444_s3 }
 0x6ac   :  { %v514_v57 = vpop.permute.xlu1 %513 }
 0x6ad   :  { %v516_v58 = vadd.f32 %v514_v57, %v506_v56 }
 0x6af   :  { %1298 = vtanh.f32 %v516_v58 }
 0x6b0   :  { %1300 = vpow2.f32 %v1136_v60 }
 0x6b9   :  { %v1299_v59 = vpop.eup %1298 }
 0x6ba   :  { %519 = vrot.lane.b32.xlu0 %v1299_v59, %s1444_s3  ;;  %v1301_v61 = vpop.eup %1300 }
 0x6bb   :  { %v500_v62 = vadd.f32 1.0, %v1301_v61 }
 0x6bd   :  { %1302 = vrcp.f32 %v500_v62 }
 0x6c7   :  { %v1303_v63 = vpop.eup %1302 }
 0x72c   :  { %v520_v3 = vpop.permute.xlu0 %519 }
 0x72d   :  { %v522_v4 = vmul.f32 %v1303_v63, %v520_v3 }
 0x72f   :  { %v525_v7 = vpack.c.bf16 %v522_v4, %v522_v4 }
 0x731   :  { %1137 = vmatmul.mubr.msk.bf16.vlgmr.msra.gmra.mrb[8].mxu1 %vm288_vm2, %v525_v7 }
 0x732   :  { %688 = vmatpush1.bf16.msra.mxu1 %v1555_v2  ;;  %719 = vmatprep.mubr.bf16.mxu1 %v1443_v0 }
 0x733   :  { %689 = vmatprep.subr.bf16.mxu1 %v1562_v5 }
 0x736   :  { %690 = vmatpush1.bf16.msra.mxu1 %v1567_v6 }
 0x737   :  { %691 = vmatprep.subr.bf16.mxu1 %v1573_v10 }
 0x73a   :  { %692 = vmatpush1.bf16.msra.mxu1 %v1579_v12 }
 0x73b   :  { %693 = vmatprep.subr.bf16.mxu1 %v1588_v14 }
 0x73e   :  { %694 = vmatpush1.bf16.msra.mxu1 %v1595_v15 }
 0x73f   :  { %845 = vmatprep.subr.bf16.mxu1 %v1550_v1 }
 0x804   :  { %v563_v11 = vpop.f32.mrb[8].mxu1 }
 0x805   :  { %v570_v13 = vadd.f32 %v563_v11, %v198_v8  ;;  %v565_v16 = vpop.f32.mrb[9].mxu1 }
 0x806   :  { %v571_v17 = vadd.f32 %v565_v16, %v200_v9  ;;  %v567_v18 = vpop.f32.mrb[10].mxu1  ;;  %v208_v16 = vadd.f32 %v1670_v29, %v1623_v21 }
 0x807   :  { %v568_v19 = vpop.f32.mrb[11].mxu1  ;;  %v1138_v22 = vmul.f32 -1.442695, %v570_v13 }
 0x808   :  { %1304 = vtanh.f32 %v571_v17  ;;  %v1139_v40 = vmul.f32 -1.442695, %v571_v17 }
 0x809   :  { %1306 = vpow2.f32 %v1138_v22 }
 0x812   :  { %v1305_v20 = vpop.eup %1304 }
 0x813   :  { %587 = vrot.lane.b32.xlu1 %v1305_v20, %s1444_s3  ;;  %v1307_v24 = vpop.eup %1306 }
 0x814   :  { %v578_v1 = vadd.f32 1.0, %v1307_v24 }
 0x816   :  { %1308 = vrcp.f32 %v578_v1 }
 0x820   :  { %v1309_v31 = vpop.eup %1308 }
 0x821   :  { %v585_v26 = vmul.f32 %v1309_v31, %v516_v58 }
 0x885   :  { %v588_v25 = vpop.permute.xlu1 %587 }
 0x886   :  { %v590_v32 = vmul.f32 %v1309_v31, %v588_v25 }
 0x888   :  { %592 = vrot.lane.b32.xlu0 %v590_v32, %s1444_s3 }
 0x8fa   :  { %v593_v37 = vpop.permute.xlu0 %592 }
 0x8fb   :  { %v595_v38 = vadd.f32 %v593_v37, %v585_v26 }
 0x8fd   :  { %1310 = vtanh.f32 %v595_v38 }
 0x8fe   :  { %1312 = vpow2.f32 %v1139_v40 }
 0x907   :  { %v1311_v39 = vpop.eup %1310 }
 0x908   :  { %598 = vrot.lane.b32.xlu1 %v1311_v39, %s1444_s3  ;;  %v1313_v41 = vpop.eup %1312 }
 0x909   :  { %v579_v42 = vadd.f32 1.0, %v1313_v41  ;;  %v214_v41 = vadd.f32 %v1674_v33, %v1623_v21 }
 0x90b   :  { %1314 = vrcp.f32 %v579_v42  ;;  %v216_v42 = vadd.f32 %v1676_v34, %v1625_v23 }
 0x915   :  { %v1315_v43 = vpop.eup %1314 }
 0x97a   :  { %v599_v44 = vpop.permute.xlu1 %598 }
 0x97b   :  { %v601_v45 = vmul.f32 %v1315_v43, %v599_v44 }
 0x97d   :  { %v604_v46 = vpack.c.bf16 %v601_v45, %v601_v45 }
 0x97f   :  { %1140 = vmatmul.mubr.msk.bf16.vlgmr.msra.gmra.mrb[20].mxu0 %vm288_vm2, %v604_v46 }
 0x980   :  { %767 = vmatpush1.bf16.msra.mxu0 %v1555_v2  ;;  %798 = vmatprep.mubr.bf16.mxu0 %v1443_v0 }
 0x981   :  { %768 = vmatprep.subr.bf16.mxu0 %v1562_v5 }
 0x984   :  { %769 = vmatpush1.bf16.msra.mxu0 %v1567_v6 }
 0x985   :  { %770 = vmatprep.subr.bf16.mxu0 %v1573_v10 }
 0x988   :  { %771 = vmatpush1.bf16.msra.mxu0 %v1579_v12 }
 0x989   :  { %772 = vmatprep.subr.bf16.mxu0 %v1588_v14 }
 0x98c   :  { %773 = vmatpush1.bf16.msra.mxu0 %v1595_v15 }
 0xa52   :  { %v642_v49 = vpop.f32.mrb[20].mxu0 }
 0xa53   :  { %v649_v50 = vadd.f32 %v642_v49, %v204_v47  ;;  %v644_v51 = vpop.f32.mrb[21].mxu0 }
 0xa54   :  { %v650_v52 = vadd.f32 %v644_v51, %v206_v48  ;;  %v646_v53 = vpop.f32.mrb[22].mxu0 }
 0xa55   :  { %v647_v54 = vpop.f32.mrb[23].mxu0  ;;  %v1141_v56 = vmul.f32 -1.442695, %v649_v50 }
 0xa56   :  { %1316 = vtanh.f32 %v650_v52  ;;  %v1142_v3 = vmul.f32 -1.442695, %v650_v52 }
 0xa57   :  { %1318 = vpow2.f32 %v1141_v56 }
 0xa60   :  { %v1317_v55 = vpop.eup %1316 }
 0xa61   :  { %666 = vrot.lane.b32.xlu0 %v1317_v55, %s1444_s3  ;;  %v1319_v57 = vpop.eup %1318 }
 0xa62   :  { %v657_v58 = vadd.f32 1.0, %v1319_v57 }
 0xa64   :  { %1320 = vrcp.f32 %v657_v58 }
 0xa6e   :  { %v1321_v59 = vpop.eup %1320 }
 0xa6f   :  { %v664_v28 = vmul.f32 %v1321_v59, %v595_v38 }
 0xad3   :  { %v667_v27 = vpop.permute.xlu0 %666 }
 0xad4   :  { %v669_v60 = vmul.f32 %v1321_v59, %v667_v27 }
 0xad6   :  { %671 = vrot.lane.b32.xlu1 %v669_v60, %s1444_s3 }
 0xb48   :  { %v672_v61 = vpop.permute.xlu1 %671 }
 0xb49   :  { %v674_v62 = vadd.f32 %v672_v61, %v664_v28 }
 0xb4b   :  { %1322 = vtanh.f32 %v674_v62 }
 0xb4c   :  { %1324 = vpow2.f32 %v1142_v3  ;;  %v220_v3 = vadd.f32 %v1680_v36, %v1625_v23  ;;  %v919_v36 = vld [vmem:[#allocation5 + $0x8] sm:$0xff] }
 0xb55   :  { %v1323_v63 = vpop.eup %1322 }
 0xb56   :  { %677 = vrot.lane.b32.xlu0 %v1323_v63, %s1444_s3  ;;  %v1325_v4 = vpop.eup %1324  ;;  %v218_v63 = vadd.f32 %v1678_v35, %v1623_v21 }
 0xb57   :  { %v658_v7 = vadd.f32 1.0, %v1325_v4 }
 0xb59   :  { %1326 = vrcp.f32 %v658_v7 }
 0xb63   :  { %v1327_v8 = vpop.eup %1326 }
 0xbc8   :  { %v678_v9 = vpop.permute.xlu0 %677 }
 0xbc9   :  { %v680_v11 = vmul.f32 %v1327_v8, %v678_v9 }
 0xbcb   :  { %v683_v13 = vpack.c.bf16 %v680_v11, %v680_v11 }
 0xbcd   :  { %1143 = vmatmul.mubr.msk.bf16.vlgmr.msra.gmra.mrb[12].mxu1 %vm288_vm2, %v683_v13 }
 0xbce   :  { %846 = vmatpush1.bf16.msra.mxu1 %v1555_v2  ;;  %877 = vmatprep.mubr.bf16.mxu1 %v1443_v0  ;;  %v210_v2 = vadd.f32 %v1672_v30, %v1625_v23  ;;  %v918_v23 = vld [vmem:[#allocation5] sm:$0xff] }
 0xbcf   :  { %847 = vmatprep.subr.bf16.mxu1 %v1562_v5 }
 0xbd2   :  { %848 = vmatpush1.bf16.msra.mxu1 %v1567_v6 }
 0xbd3   :  { %849 = vmatprep.subr.bf16.mxu1 %v1573_v10 }
 0xbd6   :  { %850 = vmatpush1.bf16.msra.mxu1 %v1579_v12 }
 0xbd7   :  { %851 = vmatprep.subr.bf16.mxu1 %v1588_v14 }
 0xbda   :  { %852 = vmatpush1.bf16.msra.mxu1 %v1595_v15 }
 0xca0   :  { %v721_v17 = vpop.f32.mrb[12].mxu1 }
 0xca1   :  { %v728_v0 = vadd.f32 %v721_v17, %v208_v16  ;;  %v723_v18 = vpop.f32.mrb[13].mxu1 }
 0xca2   :  { %v729_v5 = vadd.f32 %v723_v18, %v210_v2  ;;  %v725_v19 = vpop.f32.mrb[14].mxu1 }
 0xca3   :  { %v726_v6 = vpop.f32.mrb[15].mxu1  ;;  %v1144_v12 = vmul.f32 -1.442695, %v728_v0  ;;  %v1445_v19 = vmov 0.0|0.0  }
 0xca4   :  { %1328 = vtanh.f32 %v729_v5  ;;  %v1145_v25 = vmul.f32 -1.442695, %v729_v5  ;;  %v920_v5 = vld [vmem:[#allocation5 + $0x10] sm:$0xff]  ;;  %1213 = vmatprep.subr.bf16.mxu0 %v1445_v19  ;;  %v1214_v6 = vpack.c.bf16 %v919_v36, %v918_v23  ;;  %1225 = vmatprep.subr.bf16.mxu1 %v1445_v19 }
 0xca5   :  { %1330 = vpow2.f32 %v1144_v12 }
 0xcae   :  { %v1329_v10 = vpop.eup %1328 }
 0xcaf   :  { %745 = vrot.lane.b32.xlu1 %v1329_v10, %s1444_s3  ;;  %v1331_v14 = vpop.eup %1330  ;;  %v921_v10 = vld [vmem:[#allocation5 + $0x18] sm:$0xff] }
 0xcb0   :  { %v736_v15 = vadd.f32 1.0, %v1331_v14  ;;  %v1217_v12 = vpack.c.bf16 %v921_v10, %v920_v5  ;;  %v922_v14 = vld [vmem:[#allocation5 + $0x20] sm:$0xff] }
 0xcb2   :  { %1332 = vrcp.f32 %v736_v15  ;;  %v923_v15 = vld [vmem:[#allocation5 + $0x28] sm:$0xff] }
 0xcbc   :  { %v1333_v20 = vpop.eup %1332 }
 0xcbd   :  { %v743_v30 = vmul.f32 %v1333_v20, %v674_v62 }
 0xd21   :  { %v746_v29 = vpop.permute.xlu1 %745 }
 0xd22   :  { %v748_v22 = vmul.f32 %v1333_v20, %v746_v29  ;;  %v1220_v20 = vpack.c.bf16 %v923_v15, %v922_v14  ;;  %v924_v29 = vld [vmem:[#allocation5 + $0x30] sm:$0xff] }
 0xd24   :  { %750 = vrot.lane.b32.xlu0 %v748_v22, %s1444_s3  ;;  %v925_v22 = vld [vmem:[#allocation5 + $0x38] sm:$0xff] }
 0xd96   :  { %v751_v24 = vpop.permute.xlu0 %750 }
 0xd97   :  { %v753_v1 = vadd.f32 %v751_v24, %v743_v30  ;;  %v1223_v30 = vpack.c.bf16 %v925_v22, %v924_v29 }
 0xd99   :  { %1334 = vtanh.f32 %v753_v1 }
 0xd9a   :  { %1336 = vpow2.f32 %v1145_v25  ;;  %v1447_v25 = vmov 0.0  }
 0xda3   :  { %v1335_v31 = vpop.eup %1334 }
 0xda4   :  { %756 = vrot.lane.b32.xlu1 %v1335_v31, %s1444_s3  ;;  %v1337_v32 = vpop.eup %1336 }
 0xda5   :  { %v737_v26 = vadd.f32 1.0, %v1337_v32  ;;  %v1007_v32 = vld [vmem:[#allocation7] sm:$0xff] }
 0xda7   :  { %1338 = vrcp.f32 %v737_v26  ;;  %v1008_v26 = vld [vmem:[#allocation7 + $0x8] sm:$0xff] }
 0xdb1   :  { %v1339_v37 = vpop.eup %1338 }
 0xe16   :  { %v757_v38 = vpop.permute.xlu1 %756 }
 0xe17   :  { %v759_v39 = vmul.f32 %v1339_v37, %v757_v38  ;;  %v1009_v37 = vld [vmem:[#allocation7 + $0x10] sm:$0xff]  ;;  %v1226_v38 = vpack.c.bf16 %v1008_v26, %v1007_v32 }
 0xe19   :  { %v762_v40 = vpack.c.bf16 %v759_v39, %v759_v39  ;;  %v1010_v39 = vld [vmem:[#allocation7 + $0x18] sm:$0xff] }
 0xe1b   :  { %1146 = vmatmul.mubr.msk.bf16.vlgmr.msra.gmra.mrb[24].mxu0 %vm288_vm2, %v762_v40  ;;  %v1229_v40 = vpack.c.bf16 %v1010_v39, %v1009_v37 }
 0xe1c   :  { %1215 = vmatpush3.bf16.msra.mxu0 %v1214_v6  ;;  %1191 = vmatprep.mubr.msk.f32.mxu0 %vm1446_vm3, %v1447_v25 }
 0xe1d   :  { %1216 = vmatprep.subr.bf16.mxu0 %v1445_v19 }
 0xe20   :  { %1218 = vmatpush3.bf16.msra.mxu0 %v1217_v12 }
 0xe21   :  { %1219 = vmatprep.subr.bf16.mxu0 %v1445_v19 }
 0xe24   :  { %1221 = vmatpush3.bf16.msra.mxu0 %v1220_v20 }
 0xe25   :  { %1222 = vmatprep.subr.bf16.mxu0 %v1445_v19 }
 0xe28   :  { %1224 = vmatpush3.bf16.msra.mxu0 %v1223_v30 }
 0xeee   :  { %v800_v43 = vpop.f32.mrb[24].mxu0 }
 0xeef   :  { %v807_v44 = vadd.f32 %v800_v43, %v214_v41  ;;  %v802_v45 = vpop.f32.mrb[25].mxu0  ;;  %v1011_v41 = vld [vmem:[#allocation7 + $0x20] sm:$0xff] }
 0xef0   :  { %v808_v46 = vadd.f32 %v802_v45, %v216_v42  ;;  %v804_v47 = vpop.f32.mrb[26].mxu0  ;;  %v1012_v42 = vld [vmem:[#allocation7 + $0x28] sm:$0xff] }
 0xef1   :  { %v805_v48 = vpop.f32.mrb[27].mxu0  ;;  %v1147_v50 = vmul.f32 -1.442695, %v807_v44  ;;  %v1232_v43 = vpack.c.bf16 %v1012_v42, %v1011_v41 }
 0xef2   :  { %1340 = vtanh.f32 %v808_v46  ;;  %v1148_v58 = vmul.f32 -1.442695, %v808_v46 }
 0xef3   :  { %1342 = vpow2.f32 %v1147_v50 }
 0xefc   :  { %v1341_v49 = vpop.eup %1340 }
 0xefd   :  { %824 = vrot.lane.b32.xlu0 %v1341_v49, %s1444_s3  ;;  %v1343_v51 = vpop.eup %1342 }
 0xefe   :  { %v815_v52 = vadd.f32 1.0, %v1343_v51  ;;  %v1013_v51 = vld [vmem:[#allocation7 + $0x30] sm:$0xff] }
 0xf00   :  { %1344 = vrcp.f32 %v815_v52  ;;  %v1014_v52 = vld [vmem:[#allocation7 + $0x38] sm:$0xff] }
 0xf0a   :  { %v1345_v53 = vpop.eup %1344 }
 0xf0b   :  { %v822_v34 = vmul.f32 %v1345_v53, %v753_v1 }
 0xf6f   :  { %v825_v33 = vpop.permute.xlu0 %824 }
 0xf70   :  { %v827_v54 = vmul.f32 %v1345_v53, %v825_v33  ;;  %v1235_v53 = vpack.c.bf16 %v1014_v52, %v1013_v51  ;;  %v1152_v33 = vld [vmem:[%s1778_s5] ss:$0 sm:$0xff] }
 0xf72   :  { %829 = vrot.lane.b32.xlu1 %v827_v54, %s1444_s3 }
 0xfe4   :  { %v830_v55 = vpop.permute.xlu1 %829 }
 0xfe5   :  { %v832_v56 = vadd.f32 %v830_v55, %v822_v34 }
 0xfe7   :  { %1346 = vtanh.f32 %v832_v56 }
 0xfe8   :  { %1348 = vpow2.f32 %v1148_v58 }
 0xff1   :  { %v1347_v57 = vpop.eup %1346 }
 0xff2   :  { %835 = vrot.lane.b32.xlu0 %v1347_v57, %s1444_s3  ;;  %v1349_v59 = vpop.eup %1348  ;;  %v1154_v57 = vld [vmem:[%s1780_s7] ss:$0 sm:$0xff] }
 0xff3   :  { %v816_v27 = vadd.f32 1.0, %v1349_v59 }
 0xff5   :  { %1350 = vrcp.f32 %v816_v27 }
 0xfff   :  { %v1351_v60 = vpop.eup %1350 }
0x1064   :  { %v836_v28 = vpop.permute.xlu0 %835 }
0x1065   :  { %v838_v61 = vmul.f32 %v1351_v60, %v836_v28 }
0x1067   :  { %v841_v62 = vpack.c.bf16 %v838_v61, %v838_v61 }
0x1069   :  { %1149 = vmatmul.mubr.msk.bf16.vlgmr.msra.gmra.mrb[16].mxu1 %vm288_vm2, %v841_v62 }
0x106a   :  { %1210 = vmatprep.mubr.msk.f32.mxu1 %vm1446_vm3, %v1447_v25  ;;  %1227 = vmatpush3.bf16.msra.mxu1 %v1226_v38 }
0x106b   :  { %1228 = vmatprep.subr.bf16.mxu1 %v1445_v19 }
0x106e   :  { %1230 = vmatpush3.bf16.msra.mxu1 %v1229_v40 }
0x106f   :  { %1231 = vmatprep.subr.bf16.mxu1 %v1445_v19 }
0x1072   :  { %1233 = vmatpush3.bf16.msra.mxu1 %v1232_v43 }
0x1073   :  { %1234 = vmatprep.subr.bf16.mxu1 %v1445_v19 }
0x1076   :  { %1236 = vmatpush3.bf16.msra.mxu1 %v1235_v53 }
0x113c   :  { %v879_v4 = vpop.f32.mrb[16].mxu1 }
0x113d   :  { %v886_v7 = vadd.f32 %v879_v4, %v218_v63  ;;  %v881_v8 = vpop.f32.mrb[17].mxu1 }
0x113e   :  { %v887_v9 = vadd.f32 %v881_v8, %v220_v3  ;;  %v883_v11 = vpop.f32.mrb[18].mxu1 }
0x113f   :  { %v884_v13 = vpop.f32.mrb[19].mxu1  ;;  %v1150_v2 = vmul.f32 -1.442695, %v886_v7 }
0x1140   :  { %1352 = vtanh.f32 %v887_v9  ;;  %v1151_v45 = vmul.f32 -1.442695, %v887_v9 }
0x1141   :  { %1354 = vpow2.f32 %v1150_v2 }
0x114a   :  { %v1353_v16 = vpop.eup %1352 }
0x114b   :  { %903 = vrot.lane.b32.xlu1 %v1353_v16, %s1444_s3  ;;  %v1355_v17 = vpop.eup %1354 }
0x114c   :  { %v894_v0 = vadd.f32 1.0, %v1355_v17 }
0x114e   :  { %1356 = vrcp.f32 %v894_v0 }
0x1158   :  { %v1357_v18 = vpop.eup %1356 }
0x1159   :  { %v901_v24 = vmul.f32 %v1357_v18, %v832_v56 }
0x11bd   :  { %v904_v21 = vpop.permute.xlu1 %903 }
0x11be   :  { %v906_v35 = vmul.f32 %v1357_v18, %v904_v21 }
0x11c0   :  { %908 = vrot.lane.b32.xlu0 %v906_v35, %s1444_s3 }
0x1232   :  { %v909_v1 = vpop.permute.xlu0 %908 }
0x1233   :  { %v911_v31 = vadd.f32 %v909_v1, %v901_v24 }
0x1235   :  { %1358 = vtanh.f32 %v911_v31 }
0x1236   :  { %1360 = vpow2.f32 %v1151_v45 }
0x123f   :  { %v1359_v44 = vpop.eup %1358 }
0x1240   :  { %914 = vrot.lane.b32.xlu1 %v1359_v44, %s1444_s3  ;;  %v1361_v46 = vpop.eup %1360 }
0x1241   :  { %v895_v47 = vadd.f32 1.0, %v1361_v46 }
0x1243   :  { %1362 = vrcp.f32 %v895_v47 }
0x124d   :  { %v1363_v48 = vpop.eup %1362 }
0x12b2   :  { %v915_v49 = vpop.permute.xlu1 %914 }
0x12b3   :  { %v917_v50 = vmul.f32 %v1363_v48, %v915_v49 }
0x12b5   :  { %1192 = vmatmul.mubr.msk.f32.vlgmr.msra.gmra.mrb[28].mxu0 %vm288_vm2, %v917_v50 }
0x1388   :  { %v1002_v54 = vpop.f32.mrb[28].mxu0 }
0x1389   :  { %v1003_v34 = vadd.f32 %v1152_v33, %v1002_v54  ;;  %v1193_v55 = vpop.f32.mrb[29].mxu0 }
0x138b   :  { %v1006_v56 = vmax.f32 %v1003_v34, 0.0 }
0x138d   :  { %1211 = vmatmul.mubr.msk.f32.vlgmr.msra.gmra.mrb[20].mxu1 %vm288_vm2, %v1006_v56 }
0x1460   :  { %v1091_v58 = vpop.f32.mrb[20].mxu1 }
0x1461   :  { %v1092_v59 = vadd.f32 %v1154_v57, %v1091_v58  ;;  %v1212_v27 = vpop.f32.mrb[21].mxu1 }
0x1463   :  { %v1156_v60 = vmul.f32 -1.442695, %v1092_v59 }
0x1465   :  { %1364 = vpow2.f32 %v1156_v60 }
0x146f   :  { %v1365_v28 = vpop.eup %1364 }
0x1470   :  { %v1098_v61 = vadd.f32 1.0, %v1365_v28 }
0x1472   :  { %1366 = vrcp.f32 %v1098_v61 }
0x147c   :  { %v1367_v62 = vpop.eup %1366 }
0x147d   :  { %1101 = vst [vmem:[%s1781_s8] sm:$0xff] %v1367_v62 }
0x147e   :  { %1106 = vsyncpa [#allocation4], 1 }
0x147f   :  { %1107 = vsyncpa [#allocation6], 1 }

</bundles_post_ra>
